<compile_context>
chip_gen: v7x
topology: tpu7x:2x2x1
jax: 0.10.0
libtpu: 0.0.40
codegen_flags: <defaults>
</compile_context>

<pallas_src>
import numpy as np
import jax
import jax.numpy as jnp
from jax.experimental import pallas as pl
from jax.experimental.pallas import tpu as pltpu


def make_istft_weights(fftsize, window_size, stride):
    """Mirrors ISTFT.__init__ exactly (numpy, deterministic)."""
    analysis = np.hamming(window_size)
    synth = np.zeros(fftsize)
    for i in range(stride):
        amp = 0.0
        for j in range(fftsize // stride):
            amp += analysis[i + j * stride] * analysis[i + j * stride]
        for j in range(fftsize // stride):
            synth[i + j * stride] = analysis[i + j * stride] / amp
    window_func = synth  # length fftsize (== window_size here)

    nfreq = fftsize // 2 + 1
    coef_cos = np.zeros((nfreq, window_size))
    coef_sin = np.zeros((nfreq, window_size))
    for w in range(nfreq):
        alpha = 1.0 if (w == 0 or w == fftsize // 2) else 2.0
        alpha /= fftsize
        for t in range(window_size):
            coef_cos[w, t] = alpha * np.cos(2.0 * np.pi * w * t / fftsize)
            coef_sin[w, t] = alpha * np.sin(2.0 * np.pi * w * t / fftsize)
    wc = (coef_cos * window_func).astype(np.float32)  # decoder_re.weight[:, 0, :]
    ws = (coef_sin * window_func).astype(np.float32)  # decoder_im.weight[:, 0, :]
    return wc, ws


def make_fused_weight(wc, ws):
    """Interleave [wc; -ws] to match the (B,T,F,2)->(B,T,2F) flatten order,
    then drop the two all-zero imaginary rows (DC bin w=0 and Nyquist bin
    w=fftsize/2, where sin == 0 up to ~1e-18) so K = 2F-2 (a dense 256 here:
    no 258->384 MXU lane padding)."""
    F, W = wc.shape
    w_cat = np.empty((2 * F, W), dtype=np.float32)
    w_cat[0::2] = wc       # multiplies real parts
    w_cat[1::2] = -ws      # multiplies imaginary parts (output = cos - sin)
    keep = np.r_[0, np.arange(2, 2 * F - 1)]   # drop rows 1 (im_0) and 2F-1 (im_Nyq)
    return np.ascontiguousarray(w_cat[keep])   # (2F-2, W)


def _pick_num_blocks(B, T):
    """2-wide parallel grid only when the chip has 2 TensorCores (v7x) AND each
    half still has enough M rows (Bb*T >= 128) to be worth an MXU pass.
    Otherwise a single grid step: on 1-TC v5e/v6e the split is pure overhead
    (~0.35us prologue + extra pipeline bubble) on a few-us kernel."""
    if B < 2 or B % 2 != 0 or (B // 2) * T < 128:
        return 1
    try:
        kind = jax.devices()[0].device_kind.lower()
    except Exception:
        return 1
    return 2 if "v7" in kind else 1


def _istft_kernel(x_ref, w_ref, o_ref):
    Bb, T, K = x_ref.shape            # (batch-chunk, frames, 2F-2) bf16
    _, n_rows, s = o_ref.shape        # (batch-chunk, T+R-1, stride) f32
    W = w_ref.shape[1]
    R = W // s                        # overlap factor

    # Fused re/im synthesis: one MXU matmul over the dense contraction axis,
    # batch folded into M. bf16 operands, f32 accumulation.
    xr = x_ref[...].reshape(Bb * T, K)
    d = jnp.dot(xr, w_ref[...], preferred_element_type=jnp.float32)  # (Bb*T, W)

    # Value-side overlap-add, then a single aligned lane-dense full-block
    # store (no masked read-modify-write on o_ref, no zero-init store).
    if R > 2:
        zpad = jnp.zeros((Bb, R - 1, s), jnp.float32)
    acc = None
    for r in range(R):
        chunk = d[:, r * s:(r + 1) * s].reshape(Bb, T, s)   # aligned lane slice
        if R <= 2:
            # Low overlap: explicit zero-row concatenation is cheapest.
            pieces = []
            if r > 0:
                pieces.append(jnp.zeros((Bb, r, s), jnp.float32))
            pieces.append(chunk)
            pad_bot = n_rows - T - r
            if pad_bot > 0:
                pieces.append(jnp.zeros((Bb, pad_bot, s), jnp.float32))
            shifted = jnp.concatenate(pieces, axis=1) if len(pieces) > 1 else chunk
        else:
            # High overlap (R>2): shift via sublane roll of one zero-padded
            # base (XLU slot, idle here) instead of R growing concatenates.
            base = jnp.concatenate([chunk, zpad], axis=1)     # (Bb, n_rows, s)
            shifted = base if r == 0 else pltpu.roll(base, shift=r, axis=1)
        acc = shifted if acc is None else acc + shifted
    o_ref[...] = acc


def istft_pallas(x, w_cat, stride):
    """x: (B, T, F, 2) float32.  w_cat: fused weight bank (2F-2 or 2F, W).
    Returns (B, 1, (T-1)*stride + window_size) float32."""
    B, T, F, two = x.shape
    assert two == 2
    K, W = w_cat.shape
    assert W % stride == 0, "window_size must be a multiple of stride"
    R = W // stride
    n_rows = T + R - 1                # number of stride-sized output chunks

    # Free, contiguous reshape: last axis is [re_0, im_0, re_1, im_1, ...].
    x_flat = x.reshape(B, T, 2 * F)
    if K == 2 * F - 2:
        # Drop the columns matching the dropped all-zero weight rows
        # (im_0 at index 1, im_Nyquist at index 2F-1): two contiguous slices
        # + one concat, keeping the contraction axis dense (K=256 here).
        x_packed = jnp.concatenate([x_flat[..., :1], x_flat[..., 2:2 * F - 1]],
                                   axis=-1)
    else:
        assert K == 2 * F
        x_packed = x_flat
    # DEFAULT MXU precision rounds operands to bf16 anyway -> pre-cast to
    # halve HBM->VMEM DMA bytes and double-buffered VMEM. Accumulation is f32.
    x_packed = x_packed.astype(jnp.bfloat16)
    w = w_cat.astype(jnp.bfloat16)

    n_blocks = _pick_num_blocks(B, T)
    Bb = B // n_blocks
    # Guard: the in-kernel (Bb,T,K)->(Bb*T,K) reshape is free only if Bb==1 or
    # T is a sublane multiple; otherwise it would materialize a VMEM relayout.
    assert Bb == 1 or T % 8 == 0, "pad T to a multiple of 8 or use a per-batch grid"
    # NOTE: stride=128 keeps the output block exactly lane-dense. For hop<128,
    # refactor the output to (Bb, L//128, 128) instead of putting a sub-128
    # stride on the lane axis (avoids masked vst.msk partial stores).

    sem = ("parallel",) if n_blocks == 2 else ("arbitrary",)

    # Explicit VMEM budgeting: only raise the scoped limit when the
    # double-buffered working set needs it (production-sized T on v7x's
    # 32 MiB scoped default / 64 MiB physical).
    x_blk = Bb * T * K * 2                      # bf16 input block
    w_blk = K * W * 2                           # bf16 weight block
    o_blk = Bb * n_rows * stride * 4            # f32 output block
    d_tmp = Bb * T * W * 4                      # f32 matmul result
    ola_tmp = (R + 1) * Bb * n_rows * stride * 4  # f32 shifted copies + acc
    vmem_need = 2 * (x_blk + w_blk + o_blk) + d_tmp + ola_tmp + (1 << 20)
    cp_kwargs = dict(dimension_semantics=sem)
    if vmem_need > (30 << 20):
        # TODO(synk): for very large T, prefer a T-tiling grid axis with an
        # (R-1)-row carry accumulator instead of only raising the scoped limit.
        cp_kwargs["vmem_limit_bytes"] = int(min(vmem_need * 5 // 4, 100 << 20))

    out = pl.pallas_call(
        _istft_kernel,
        out_shape=jax.ShapeDtypeStruct((B, n_rows, stride), jnp.float32),
        grid_spec=pltpu.PrefetchScalarGridSpec(
            num_scalar_prefetch=0,
            grid=(n_blocks,),
            in_specs=[
                pl.BlockSpec((Bb, T, K), lambda b: (b, 0, 0)),
                # Weight bank: constant block index across the grid.
                pl.BlockSpec((K, W), lambda b: (0, 0)),
            ],
            out_specs=pl.BlockSpec((Bb, n_rows, stride), lambda b: (b, 0, 0)),
        ),
        compiler_params=pltpu.CompilerParams(**cp_kwargs),
    )(x_packed, w)

    # Row-major flatten of (n_rows, stride) == overlap-added time signal.
    return out.reshape(B, 1, n_rows * stride)


def ref_istft(x, wc, ws, stride):
    """Pure numpy (float64) reference of the ConvTranspose1d-based forward."""
    x = np.asarray(x, dtype=np.float64)
    B, T, F, _ = x.shape
    W = wc.shape[1]
    L = (T - 1) * stride + W
    frames = (np.einsum('btf,fw->btw', x[..., 0], wc.astype(np.float64))
              - np.einsum('btf,fw->btw', x[..., 1], ws.astype(np.float64)))
    out = np.zeros((B, 1, L), dtype=np.float64)
    for t in range(T):
        out[:, 0, t * stride:t * stride + W] += frames[:, t, :]
    return out.astype(np.float32)


if __name__ == "__main__":
    fftsize = 256
    window_size = 256
    stride = 128
    B = 2
    T = 8                      # number of STFT frames
    F = fftsize // 2 + 1       # 129 frequency bins

    wc_np, ws_np = make_istft_weights(fftsize, window_size, stride)
    w_cat = jnp.asarray(make_fused_weight(wc_np, ws_np))   # (256, 256) dense

    key = jax.random.PRNGKey(0)
    x = jax.random.normal(key, (B, T, F, 2), dtype=jnp.float32)

    out = istft_pallas(x, w_cat, stride)
    out = jax.block_until_ready(out)

    expected = ref_istft(np.asarray(x), wc_np, ws_np, stride)
    assert out.shape == expected.shape, (out.shape, expected.shape)
    # Operands are bf16 (what DEFAULT MXU precision would round to anyway) on a
    # K=256 f32-accumulated contraction; tolerance covers that rounding while
    # still catching any structural (interleave / zero-row-drop / overlap-add)
    # bug, which would produce O(1) relative errors.
    np.testing.assert_allclose(np.asarray(out), expected, rtol=2e-2, atol=1e-2)

    print("KERNEL_OK")
</pallas_src>

<mosaic_0001>
module attributes {stable_mosaic.version = 11 : i64} {
  func.func @_istft_kernel(%arg0: i32, %arg1: memref<2x8x256xbf16, #tpu.memory_space<vmem>>, %arg2: memref<256x256xbf16, #tpu.memory_space<vmem>>, %arg3: memref<2x9x128xf32, #tpu.memory_space<vmem>>) attributes {dimension_semantics = [#tpu.dimension_semantics<arbitrary>], iteration_bounds = array<i64: 1>, scalar_prefetch = 0 : i64, scratch_operands = 0 : i64, tpu.core_type = #tpu.core_type<tc>, window_params = [{transform_indices = @transform_0, window_bounds = array<i64: 2, 8, 256>}, {pipeline_mode = #tpu.pipeline_mode<synchronous>, transform_indices = @transform_1, window_bounds = array<i64: 256, 256>}, {transform_indices = @transform_2, window_bounds = array<i64: 2, 9, 128>}]} {
    %c0 = arith.constant 0 : index
    %c0_0 = arith.constant 0 : index
    %c0_1 = arith.constant 0 : index
    %0 = vector.load %arg1[%c0, %c0_0, %c0_1] : memref<2x8x256xbf16, #tpu.memory_space<vmem>>, vector<2x8x256xbf16>
    %1 = vector.shape_cast %0 : vector<2x8x256xbf16> to vector<16x256xbf16>
    %c0_2 = arith.constant 0 : index
    %c0_3 = arith.constant 0 : index
    %2 = vector.load %arg2[%c0_2, %c0_3] : memref<256x256xbf16, #tpu.memory_space<vmem>>, vector<256x256xbf16>
    %cst = arith.constant dense<0.000000e+00> : vector<16x256xf32>
    %3 = tpu.matmul %1, %2, %cst {dimension_numbers = #tpu.dot_dimension_numbers<[1], [0], [0], [1], [0, 0, 1, 1], [], []>} : vector<16x256xbf16>, vector<256x256xbf16>, vector<16x256xf32> -> vector<16x256xf32>
    %4 = vector.extract_strided_slice %3 {offsets = [0, 0], sizes = [16, 128], strides = [1, 1]} : vector<16x256xf32> to vector<16x128xf32>
    %5 = vector.shape_cast %4 : vector<16x128xf32> to vector<2x8x128xf32>
    %cst_4 = arith.constant 0.000000e+00 : f32
    %6 = vector.broadcast %cst_4 : f32 to vector<2x1x128xf32>
    %7 = tpu.concatenate %5, %6 in 1 : vector<2x8x128xf32>, vector<2x1x128xf32> -> vector<2x9x128xf32>
    %8 = vector.extract_strided_slice %3 {offsets = [0, 128], sizes = [16, 128], strides = [1, 1]} : vector<16x256xf32> to vector<16x128xf32>
    %9 = vector.shape_cast %8 : vector<16x128xf32> to vector<2x8x128xf32>
    %cst_5 = arith.constant 0.000000e+00 : f32
    %10 = vector.broadcast %cst_5 : f32 to vector<2x1x128xf32>
    %11 = tpu.concatenate %10, %9 in 1 : vector<2x1x128xf32>, vector<2x8x128xf32> -> vector<2x9x128xf32>
    %12 = arith.addf %7, %11 : vector<2x9x128xf32>
    %c0_6 = arith.constant 0 : index
    %c0_7 = arith.constant 0 : index
    %c0_8 = arith.constant 0 : index
    %13 = vector.load %arg3[%c0_6, %c0_7, %c0_8] : memref<2x9x128xf32, #tpu.memory_space<vmem>>, vector<2x9x128xf32>
    tpu.vector_store %arg3[%c0_6, %c0_7, %c0_8], %12 {strides = array<i32>} : memref<2x9x128xf32, #tpu.memory_space<vmem>>, vector<2x9x128xf32>,
    return
  }
  func.func @transform_0(%arg0: i32) -> (i32, i32, i32) {
    %c0_i32 = arith.constant 0 : i32
    %c0_i32_0 = arith.constant 0 : i32
    %c0_i32_1 = arith.constant 0 : i32
    return %arg0, %c0_i32, %c0_i32_0 : i32, i32, i32
  }
  func.func @transform_1(%arg0: i32) -> (i32, i32) {
    %c0_i32 = arith.constant 0 : i32
    %c0_i32_0 = arith.constant 0 : i32
    %c0_i32_1 = arith.constant 0 : i32
    return %c0_i32, %c0_i32_0 : i32, i32
  }
  func.func @transform_2(%arg0: i32) -> (i32, i32, i32) {
    %c0_i32 = arith.constant 0 : i32
    %c0_i32_0 = arith.constant 0 : i32
    %c0_i32_1 = arith.constant 0 : i32
    return %arg0, %c0_i32, %c0_i32_0 : i32, i32, i32
  }
}

</mosaic_0001>

<bundles_post_ra>
// kernel: tpu_custom_call.1
= control target key start
LH: loop header
LB: loop body
LE: loop exit
PB: predicated region body
PF: predicated region fallthrough
CT: control target
= control target key end

     0   :  { %7 = vsyncpa [#allocation3], 0  ;;  %s501_s0 = inlined_call_operand.hbm [shape: bf16[2,8,256], index: 0, kind: input, shape index: {}]   ;;  %s502_s1 = inlined_call_operand.hbm [shape: bf16[256,256], index: 1, kind: input, shape index: {}]   ;;  %s503_s2 = inlined_call_operand.vmem [shape: f32[2,9,128], index: 2, kind: output, shape index: {}]  }
   0x1   :  { %8 = vsyncpa [#allocation5], 0  ;;  %s446_s9 = smov [#allocation2]   ;;  %s398_s13 = scalar_lea.hbm %s501_s0, 256 }
   0x2   :  { %s14_s10 = sshll.u32 %s446_s9, 4  ;;  %p399_p0 = scmp.ne.s32.totalorder %s501_s0, %s398_s13  ;;  %s15_s10 = int_to_ptr.vmem [resolvable:$true] %s14_s10 }
   0x3   :  { %p402_p1 = scmp.lt.u32.totalorder %s398_s13, %s501_s0 }
   0x5   :  { %p404_p2 = pnand %p402_p1, %p399_p0 }
   0x7   :  { %407 = shalt.err (!%p404_p2)
}
   0x8   :  { %s408_s18 = scalar_lea.vmem %s15_s10, 256  ;;  %p413_p4 = scmp.lt.s32.totalorder %s15_s10, %s15_s10 }
   0x9   :  { %p409_p3 = scmp.ne.s32.totalorder %s15_s10, %s408_s18  ;;  %p414_p5 = scmp.lt.s32.totalorder %s408_s18, %s408_s18 }
   0xb   :  { %p415_p6 = por %p414_p5, %p413_p4 }
   0xd   :  { %p416_p7 = pnand %p415_p6, %p409_p3 }
   0xf   :  { %419 = shalt.err (!%p416_p7)
}
  0x10   :  { %s447_s19 = smov 128   ;;  %s448_s20 = smov 8  }
  0x11   :  { %20 = dma.hbm_to_vmem [thread:$0]  %s501_s0, 256, %s15_s10, [#allocation3], %s447_s19, %s447_s19, %s448_s20  }
  0x12   :  { %s449_s23 = smov [#allocation4]   ;;  %s420_s27 = scalar_lea.hbm %s502_s1, 4096 }
  0x13   :  { %s26_s24 = sshll.u32 %s449_s23, 4  ;;  %p421_p8 = scmp.ne.s32.totalorder %s502_s1, %s420_s27  ;;  %s27_s24 = int_to_ptr.vmem [resolvable:$true] %s26_s24 }
  0x14   :  { %p424_p9 = scmp.lt.u32.totalorder %s420_s27, %s502_s1 }
  0x16   :  { %p426_p10 = pnand %p424_p9, %p421_p8 }
  0x18   :  { %429 = shalt.err (!%p426_p10)
}
  0x19   :  { %s430_s4 = scalar_lea.vmem %s27_s24, 4096  ;;  %p435_p12 = scmp.lt.s32.totalorder %s27_s24, %s27_s24 }
  0x1a   :  { %p431_p11 = scmp.ne.s32.totalorder %s27_s24, %s430_s4  ;;  %p436_p13 = scmp.lt.s32.totalorder %s430_s4, %s430_s4 }
  0x1c   :  { %p437_p0 = por %p436_p13, %p435_p12 }
  0x1e   :  { %p438_p1 = pnand %p437_p0, %p431_p11 }
  0x20   :  { %441 = shalt.err (!%p438_p1)
}
  0x21   :  { %32 = dma.hbm_to_vmem [thread:$0]  %s502_s1, 4096, %s27_s24, [#allocation5], %s447_s19, %s447_s19, %s448_s20  }
  0x22   :  { %442 = dma.done.wait [#allocation3], 256  }
  0x23   :  { %443 = vsyncadd [#allocation3], 4294967040 }
  0x24   :  { %444 = dma.done.wait [#allocation5], 4096  }
  0x25   :  { %445 = vsyncadd [#allocation5], 4294963200  ;;  %v347_v0 = vld [vmem:[#allocation4 + $0x4] ss:$8 sps:$4 sm:$0xff]   ;;  %v349_v1 = vld [vmem:[#allocation4] ss:$8 sps:$4 sm:$0xff]  }
  0x26   :  { %243 = vmatprep.subr.bf16.mxu0 %v347_v0  ;;  %v350_v2 = vld [vmem:[#allocation4 + $0x14] ss:$8 sps:$4 sm:$0xff]   ;;  %v352_v3 = vld [vmem:[#allocation4 + $0x10] ss:$8 sps:$4 sm:$0xff]   ;;  %v353_v4 = vld [vmem:[#allocation4 + $0x24] ss:$8 sps:$4 sm:$0xff]  }
  0x27   :  { %244 = vmatpush1.bf16.msra.mxu0 %v349_v1  ;;  %v355_v5 = vld [vmem:[#allocation4 + $0x20] ss:$8 sps:$4 sm:$0xff]   ;;  %v356_v6 = vld [vmem:[#allocation4 + $0x34] ss:$8 sps:$4 sm:$0xff]   ;;  %v358_v7 = vld [vmem:[#allocation4 + $0x30] ss:$8 sps:$4 sm:$0xff]  }
  0x28   :  { %245 = vmatprep.subr.bf16.mxu0 %v350_v2  ;;  %v359_v8 = vld [vmem:[#allocation4 + $0x44] ss:$8 sps:$4 sm:$0xff]   ;;  %v361_v9 = vld [vmem:[#allocation4 + $0x40] ss:$8 sps:$4 sm:$0xff]   ;;  %v362_v10 = vld [vmem:[#allocation4 + $0x54] ss:$8 sps:$4 sm:$0xff]  }
  0x29   :  { %v364_v11 = vld [vmem:[#allocation4 + $0x50] ss:$8 sps:$4 sm:$0xff]   ;;  %v365_v12 = vld [vmem:[#allocation4 + $0x64] ss:$8 sps:$4 sm:$0xff]   ;;  %v397_v13 = vld [vmem:[#allocation2 + $0x4] ss:$8 sps:$4 sm:$0xff]  }
  0x2a   :  { %v367_v14 = vld [vmem:[#allocation4 + $0x60] ss:$8 sps:$4 sm:$0xff]   ;;  %v368_v15 = vld [vmem:[#allocation4 + $0x74] ss:$8 sps:$4 sm:$0xff]   ;;  %275 = vmatprep.mubr.bf16.mxu0 %v397_v13  ;;  %v370_v16 = vld [vmem:[#allocation4 + $0x70] ss:$8 sps:$4 sm:$0xff]  }
  0x2b   :  { %246 = vmatpush1.bf16.msra.mxu0 %v352_v3  ;;  %v371_v17 = vld [vmem:[#allocation4 + $0x84] ss:$8 sps:$4 sm:$0xff]   ;;  %v373_v18 = vld [vmem:[#allocation4 + $0x80] ss:$8 sps:$4 sm:$0xff]   ;;  %v374_v19 = vld [vmem:[#allocation4 + $0x94] ss:$8 sps:$4 sm:$0xff]  }
  0x2c   :  { %247 = vmatprep.subr.bf16.mxu0 %v353_v4  ;;  %v376_v20 = vld [vmem:[#allocation4 + $0x90] ss:$8 sps:$4 sm:$0xff]   ;;  %v377_v21 = vld [vmem:[#allocation4 + $0xa4] ss:$8 sps:$4 sm:$0xff]   ;;  %v379_v22 = vld [vmem:[#allocation4 + $0xa0] ss:$8 sps:$4 sm:$0xff]  }
  0x2d   :  { %v380_v23 = vld [vmem:[#allocation4 + $0xb4] ss:$8 sps:$4 sm:$0xff]   ;;  %v382_v24 = vld [vmem:[#allocation4 + $0xb0] ss:$8 sps:$4 sm:$0xff]   ;;  %v383_v25 = vld [vmem:[#allocation4 + $0xc4] ss:$8 sps:$4 sm:$0xff]  }
  0x2e   :  { %v385_v26 = vld [vmem:[#allocation4 + $0xc0] ss:$8 sps:$4 sm:$0xff]   ;;  %v386_v27 = vld [vmem:[#allocation4 + $0xd4] ss:$8 sps:$4 sm:$0xff]   ;;  %v388_v28 = vld [vmem:[#allocation4 + $0xd0] ss:$8 sps:$4 sm:$0xff]  }
  0x2f   :  { %248 = vmatpush1.bf16.msra.mxu0 %v355_v5  ;;  %v389_v29 = vld [vmem:[#allocation4 + $0xe4] ss:$8 sps:$4 sm:$0xff]   ;;  %v391_v30 = vld [vmem:[#allocation4 + $0xe0] ss:$8 sps:$4 sm:$0xff]   ;;  %v392_v31 = vld [vmem:[#allocation4 + $0xf4] ss:$8 sps:$4 sm:$0xff]  }
  0x30   :  { %249 = vmatprep.subr.bf16.mxu0 %v356_v6  ;;  %v394_v32 = vld [vmem:[#allocation4 + $0xf0] ss:$8 sps:$4 sm:$0xff]   ;;  %vm292_vm0 = vcmask 1040384  }
  0x31   :  { %v395_v33 = vld [vmem:[#allocation2] ss:$8 sps:$4 sm:$0xff]  }
  0x33   :  { %250 = vmatpush1.bf16.msra.mxu0 %v358_v7 }
  0x34   :  { %251 = vmatprep.subr.bf16.mxu0 %v359_v8 }
  0x37   :  { %252 = vmatpush1.bf16.msra.mxu0 %v361_v9 }
  0x38   :  { %253 = vmatprep.subr.bf16.mxu0 %v362_v10 }
  0x3b   :  { %254 = vmatpush1.bf16.msra.mxu0 %v364_v11 }
  0x3c   :  { %255 = vmatprep.subr.bf16.mxu0 %v365_v12 }
  0x3f   :  { %256 = vmatpush1.bf16.msra.mxu0 %v367_v14 }
  0x40   :  { %257 = vmatprep.subr.bf16.mxu0 %v368_v15 }
  0x43   :  { %258 = vmatpush1.bf16.msra.mxu0 %v370_v16 }
  0x44   :  { %259 = vmatprep.subr.bf16.mxu0 %v371_v17 }
  0x47   :  { %260 = vmatpush1.bf16.msra.mxu0 %v373_v18 }
  0x48   :  { %261 = vmatprep.subr.bf16.mxu0 %v374_v19 }
  0x4b   :  { %262 = vmatpush1.bf16.msra.mxu0 %v376_v20 }
  0x4c   :  { %263 = vmatprep.subr.bf16.mxu0 %v377_v21 }
  0x4f   :  { %264 = vmatpush1.bf16.msra.mxu0 %v379_v22 }
  0x50   :  { %265 = vmatprep.subr.bf16.mxu0 %v380_v23 }
  0x53   :  { %266 = vmatpush1.bf16.msra.mxu0 %v382_v24 }
  0x54   :  { %267 = vmatprep.subr.bf16.mxu0 %v383_v25 }
  0x57   :  { %268 = vmatpush1.bf16.msra.mxu0 %v385_v26 }
  0x58   :  { %269 = vmatprep.subr.bf16.mxu0 %v386_v27 }
  0x5b   :  { %270 = vmatpush1.bf16.msra.mxu0 %v388_v28 }
  0x5c   :  { %271 = vmatprep.subr.bf16.mxu0 %v389_v29 }
  0x5f   :  { %272 = vmatpush1.bf16.msra.mxu0 %v391_v30 }
  0x60   :  { %273 = vmatprep.subr.bf16.mxu0 %v392_v31 }
  0x63   :  { %274 = vmatpush1.bf16.msra.mxu0 %v394_v32 }
  0x66   :  { %276 = vmatmul.mubr.bf16.vlgmr.msra.gmra.mrb[0].mxu0 %v395_v33 }
 0x139   :  { %v277_v34 = vpop.f32.mrb[0].mxu0 }
 0x13a   :  { %v279_v35 = vpop.f32.mrb[1].mxu0 }
 0x13b   :  { %v288_v36 = vrot.slane %v279_v35, 7  ;;  %v281_v37 = vpop.f32.mrb[2].mxu0 }
 0x13c   :  { %v283_v38 = vpop.f32.mrb[3].mxu0 }
 0x13d   :  { %v293_v39 = vsel %vm292_vm0, 0.0, %v288_v36  ;;  %300 = vst [vmem:[%s503_s2 + $0x8] sm:$0x1] %v288_v36  ;;  %v289_v40 = vrot.slane %v283_v38, 7 }
 0x13e   :  { %v295_v41 = vadd.f32 %v293_v39, %v277_v34 }
 0x13f   :  { %v294_v42 = vsel %vm292_vm0, 0.0, %v289_v40  ;;  %302 = vst [vmem:[%s503_s2 + $0x18] sm:$0x1] %v289_v40 }
 0x140   :  { %299 = vst [vmem:[%s503_s2] sm:$0xff] %v295_v41  ;;  %v297_v43 = vadd.f32 %v294_v42, %v281_v37 }
 0x142   :  { %301 = vst [vmem:[%s503_s2 + $0x10] sm:$0xff] %v297_v43 }
 0x143   :  { %307 = vsyncpa [#allocation3], 1 }
 0x144   :  { %308 = vsyncpa [#allocation5], 1 }

</bundles_post_ra>
